<compile_context>
chip_gen: v6e
topology: v6e:2x2x1
jax: 0.10.0
libtpu: 0.0.40
codegen_flags: <defaults>
</compile_context>

<pallas_src>
import functools

import jax
import jax.numpy as jnp
from jax.experimental import pallas as pl
from jax.experimental.pallas import tpu as pltpu


def _round_up(x, m):
    return (x + m - 1) // m * m


def _pick_tile(B, tile_b, D, H, vmem_budget=24 << 20):
    """Largest safe batch tile.

    Per-step VMEM: 2x double-buffered bf16 (tile, D) streams, the f32
    (tile, H) fc1 intermediate, a double-buffered (1, tile) f32 output row,
    plus the resident bf16 fc1 weight halves and the (2, H) f32 bias/w2 slab.
    Budgeted under 24 MiB so it fits v7x's 32 MiB scoped VMEM with headroom
    (v5e/v6e have 128 MiB physical, v7x only 64 MiB per TC).
    """
    resident = 2 * D * H * 2 + 2 * H * 4

    def fits(t):
        per_tile = 2 * (2 * t * D * 2) + t * H * 4 + 2 * t * 4
        return resident + per_tile <= vmem_budget

    t = max(128, (tile_b // 128) * 128)
    while t > 128 and not fits(t):
        t -= 128

    if B <= 256:
        # Single-tile path: block == full array extents, no 128-multiple
        # requirement; round to 16 for bf16 (16, 128) vreg packing.
        return _round_up(max(B, 1), 16)

    # Multi-tile path: lane-aligned tile, and >= 2 tiles so v7x's
    # ("parallel",) batch axis actually splits across both TensorCores.
    half = _round_up(-(-B // 2), 128)
    return min(t, max(128, half))


def ncf_kernel(ue_ref, ae_ref, w1u_ref, w1a_ref, bw_ref, b2_ref, out_ref):
    """One batch tile of the NCF MLP.

    ue_ref : (TILE_B, D) bf16  -- user embedding rows          (streamed)
    ae_ref : (TILE_B, D) bf16  -- adgroup embedding rows       (streamed)
    w1u_ref: (D, H)      bf16  -- fc1 weight rows for user emb (resident)
    w1a_ref: (D, H)      bf16  -- fc1 weight rows for ad emb   (resident)
    bw_ref : (2, H)      f32   -- row 0: fc1 bias, row 1: fc2 weight (resident)
    b2_ref : (1, 1)      f32   -- fc2 bias, SMEM scalar
    out_ref: (1, TILE_B) f32   -- lane-dense fc2 output row
    """
    # fc1 split over the concat axis: two bf16 MXU matmuls, f32 accumulation.
    h = jnp.dot(ue_ref[...], w1u_ref[...], preferred_element_type=jnp.float32)
    h = h + jnp.dot(ae_ref[...], w1a_ref[...], preferred_element_type=jnp.float32)
    # Bias + ReLU in f32 on the VPU (v5e-safe; no bf16 elementwise path).
    h = jnp.maximum(h + bw_ref[0:1, :], 0.0)
    # TODO(synk): dropout omitted (inference-mode identity).
    # fc2 (H -> 1): VPU multiply + XLU lane reduction (a 1-wide MXU matmul
    # would waste >99% of the output lanes).  Result is stored lane-dense.
    out_ref[0, :] = jnp.sum(h * bw_ref[1:2, :], axis=-1) + b2_ref[0, 0]


@functools.partial(jax.jit, static_argnames=("tile_b",))
def ncf_forward(user_id, adgroup_id, params, *, tile_b=2048):
    user_table = params["user_emb"]   # (num_users, D) bf16
    ad_table = params["ad_emb"]       # (num_ads, D)   bf16
    w1 = params["w1"]                 # (2D, H) bf16  (== PyTorch fc1.weight.T)
    b1 = params["b1"]                 # (H,)    f32
    w2 = params["w2"]                 # (H, 1)  f32   (== PyTorch fc2.weight.T)
    b2 = params["b2"]                 # (1,)    f32

    B = user_id.shape[0]
    D = user_table.shape[1]
    H = w1.shape[1]

    tile = _pick_tile(B, tile_b, D, H)
    num_tiles = pl.cdiv(B, tile)
    b_pad = num_tiles * tile

    # Pad the cheap int32 id vectors (NOT the bf16 activations) so every grid
    # step sees a full block; pad rows gather row 0 and are dropped below.
    if b_pad != B:
        user_id = jnp.pad(user_id, (0, b_pad - B))
        adgroup_id = jnp.pad(adgroup_id, (0, b_pad - B))

    # Embedding gathers in JAX glue; the two halves are streamed separately so
    # no (B, 2D) concat is ever materialized in HBM.
    ue = jnp.take(user_table, user_id, axis=0)      # (b_pad, D) bf16
    ae = jnp.take(ad_table, adgroup_id, axis=0)     # (b_pad, D) bf16
    # TODO(synk): for large D (>=64) fuse the gather into the kernel via
    # scalar-prefetched ids + manual make_async_copy from the HBM tables to
    # drop one activation HBM round trip.

    w1u = w1[:D, :]                                  # (D, H) bf16
    w1a = w1[D:, :]                                  # (D, H) bf16
    bw = jnp.concatenate(
        [b1.reshape(1, H).astype(jnp.float32),
         w2.reshape(1, H).astype(jnp.float32)], axis=0)      # (2, H) f32
    b2_s = b2.reshape(1, 1).astype(jnp.float32)              # (1, 1) f32 -> SMEM

    cost = pl.CostEstimate(
        flops=2 * b_pad * (2 * D) * H + 2 * b_pad * H,
        transcendentals=0,
        bytes_accessed=(
            2 * b_pad * D * 2            # ue + ae (bf16)
            + 2 * D * H * 2              # w1 halves (bf16)
            + 2 * H * 4 + 4              # bias/w2 slab + b2
            + b_pad * 4                  # output
        ),
    )

    out = pl.pallas_call(
        ncf_kernel,
        out_shape=jax.ShapeDtypeStruct((1, b_pad), jnp.float32),
        grid=(num_tiles,),
        in_specs=[
            # Streamed activations: one (tile, D) block per grid step.
            pl.BlockSpec((tile, D), lambda i: (i, 0)),
            pl.BlockSpec((tile, D), lambda i: (i, 0)),
            # Weights / biases: constant block index -> VMEM-resident.
            pl.BlockSpec((D, H), lambda i: (0, 0)),
            pl.BlockSpec((D, H), lambda i: (0, 0)),
            pl.BlockSpec((2, H), lambda i: (0, 0)),
            # fc2 bias as an SMEM scalar.
            pl.BlockSpec(memory_space=pltpu.MemorySpace.SMEM),
        ],
        # Lane-dense output row per tile.
        out_specs=pl.BlockSpec((1, tile), lambda i: (0, i)),
        compiler_params=pltpu.CompilerParams(
            dimension_semantics=("parallel",),   # shard batch tiles across TCs (v7x)
            vmem_limit_bytes=32 << 20,           # safe on v5e/v6e/v7x; tile budgeted under 24 MiB
        ),
        cost_estimate=cost,
    )(ue, ae, w1u, w1a, bw, b2_s)

    y = out.reshape(-1)[:B]
    return jnp.squeeze(y)  # matches torch `.squeeze()`: (B,) (scalar if B == 1)


def init_params(key, num_users, num_ads, embedding_dim, hidden_dim):
    k = jax.random.split(key, 6)
    return {
        # Memory-bound model: embeddings + fc1 weight stored in bf16; the MXU
        # accumulates in f32 (parameter quantization is the dominant error vs
        # an f32 reference, acceptable for serving).
        "user_emb": jax.random.normal(k[0], (num_users, embedding_dim)).astype(jnp.bfloat16),
        "ad_emb": jax.random.normal(k[1], (num_ads, embedding_dim)).astype(jnp.bfloat16),
        # Stored as (in, out) == PyTorch fc.weight.T
        "w1": (0.1 * jax.random.normal(k[2], (2 * embedding_dim, hidden_dim))).astype(jnp.bfloat16),
        "b1": 0.1 * jax.random.normal(k[3], (hidden_dim,), jnp.float32),
        "w2": 0.1 * jax.random.normal(k[4], (hidden_dim, 1), jnp.float32),
        "b2": 0.1 * jax.random.normal(k[5], (1,), jnp.float32),
    }


if __name__ == "__main__":
    num_users, num_ads = 32, 24
    embedding_dim, hidden_dim = 16, 32
    batch = 8

    key = jax.random.PRNGKey(0)
    params = init_params(key, num_users, num_ads, embedding_dim, hidden_dim)

    kid = jax.random.split(key, 2)
    user_id = jax.random.randint(kid[0], (batch,), 0, num_users, dtype=jnp.int32)
    adgroup_id = jax.random.randint(kid[1], (batch,), 0, num_ads, dtype=jnp.int32)

    out = ncf_forward(user_id, adgroup_id, params)
    jax.block_until_ready(out)

    # Reference check in plain JAX (same semantics as the PyTorch forward,
    # computed in f32 on the bf16-stored parameters; dropout = identity).
    uef = jnp.take(params["user_emb"], user_id, axis=0).astype(jnp.float32)
    aef = jnp.take(params["ad_emb"], adgroup_id, axis=0).astype(jnp.float32)
    xf = jnp.concatenate([uef, aef], axis=-1)
    h = jnp.maximum(xf @ params["w1"].astype(jnp.float32) + params["b1"], 0.0)
    ref = jnp.squeeze(h @ params["w2"] + params["b2"])

    assert out.shape == (batch,)
    assert jnp.allclose(out, ref, atol=1e-3, rtol=1e-3)

    print("KERNEL_OK")
</pallas_src>

<mosaic_0001>
module attributes {stable_mosaic.version = 11 : i64} {
  func.func @ncf_kernel(%arg0: i32, %arg1: memref<16x16xbf16, #tpu.memory_space<vmem>>, %arg2: memref<16x16xbf16, #tpu.memory_space<vmem>>, %arg3: memref<16x32xbf16, #tpu.memory_space<vmem>>, %arg4: memref<16x32xbf16, #tpu.memory_space<vmem>>, %arg5: memref<2x32xf32, #tpu.memory_space<vmem>>, %arg6: memref<1x1xf32, #tpu.memory_space<smem>>, %arg7: memref<1x16xf32, #tpu.memory_space<vmem>>) attributes {dimension_semantics = [#tpu.dimension_semantics<parallel>], iteration_bounds = array<i64: 1>, scalar_prefetch = 0 : i64, scratch_operands = 0 : i64, tpu.core_type = #tpu.core_type<tc>, window_params = [{transform_indices = @transform_0, window_bounds = array<i64: 16, 16>}, {transform_indices = @transform_1, window_bounds = array<i64: 16, 16>}, {pipeline_mode = #tpu.pipeline_mode<synchronous>, transform_indices = @transform_2, window_bounds = array<i64: 16, 32>}, {pipeline_mode = #tpu.pipeline_mode<synchronous>, transform_indices = @transform_3, window_bounds = array<i64: 16, 32>}, {pipeline_mode = #tpu.pipeline_mode<synchronous>, transform_indices = @transform_4, window_bounds = array<i64: 2, 32>}, {transform_indices = @transform_5, window_bounds = array<i64: 1, 1>}, {transform_indices = @transform_6, window_bounds = array<i64: 1, 16>}]} {
    %c0 = arith.constant 0 : index
    %c0_0 = arith.constant 0 : index
    %0 = vector.load %arg1[%c0, %c0_0] : memref<16x16xbf16, #tpu.memory_space<vmem>>, vector<16x16xbf16>
    %c0_1 = arith.constant 0 : index
    %c0_2 = arith.constant 0 : index
    %1 = vector.load %arg3[%c0_1, %c0_2] : memref<16x32xbf16, #tpu.memory_space<vmem>>, vector<16x32xbf16>
    %cst = arith.constant dense<0.000000e+00> : vector<16x32xf32>
    %2 = tpu.matmul %0, %1, %cst {dimension_numbers = #tpu.dot_dimension_numbers<[1], [0], [0], [1], [0, 0, 1, 1], [], []>} : vector<16x16xbf16>, vector<16x32xbf16>, vector<16x32xf32> -> vector<16x32xf32>
    %c0_3 = arith.constant 0 : index
    %c0_4 = arith.constant 0 : index
    %3 = vector.load %arg2[%c0_3, %c0_4] : memref<16x16xbf16, #tpu.memory_space<vmem>>, vector<16x16xbf16>
    %c0_5 = arith.constant 0 : index
    %c0_6 = arith.constant 0 : index
    %4 = vector.load %arg4[%c0_5, %c0_6] : memref<16x32xbf16, #tpu.memory_space<vmem>>, vector<16x32xbf16>
    %cst_7 = arith.constant dense<0.000000e+00> : vector<16x32xf32>
    %5 = tpu.matmul %3, %4, %cst_7 {dimension_numbers = #tpu.dot_dimension_numbers<[1], [0], [0], [1], [0, 0, 1, 1], [], []>} : vector<16x16xbf16>, vector<16x32xbf16>, vector<16x32xf32> -> vector<16x32xf32>
    %6 = arith.addf %2, %5 : vector<16x32xf32>
    %c0_8 = arith.constant 0 : index
    %c0_9 = arith.constant 0 : index
    %7 = vector.load %arg5[%c0_8, %c0_9] : memref<2x32xf32, #tpu.memory_space<vmem>>, vector<1x32xf32>
    %8 = vector.broadcast %7 : vector<1x32xf32> to vector<16x32xf32>
    %9 = arith.addf %6, %8 : vector<16x32xf32>
    %cst_10 = arith.constant 0.000000e+00 : f32
    %10 = vector.broadcast %cst_10 : f32 to vector<16x32xf32>
    %11 = arith.maximumf %9, %10 : vector<16x32xf32>
    %c1 = arith.constant 1 : index
    %c0_11 = arith.constant 0 : index
    %12 = vector.load %arg5[%c1, %c0_11] : memref<2x32xf32, #tpu.memory_space<vmem>>, vector<1x32xf32>
    %13 = vector.broadcast %12 : vector<1x32xf32> to vector<16x32xf32>
    %14 = arith.mulf %11, %13 : vector<16x32xf32>
    %cst_12 = arith.constant dense<0.000000e+00> : vector<16xf32>
    %15 = vector.multi_reduction <add>, %14, %cst_12 [1] : vector<16x32xf32> to vector<16xf32>
    %c0_13 = arith.constant 0 : index
    %c0_14 = arith.constant 0 : index
    %16 = memref.load %arg6[%c0_13, %c0_14] : memref<1x1xf32, #tpu.memory_space<smem>>
    %17 = vector.broadcast %16 : f32 to vector<16xf32>
    %18 = arith.addf %15, %17 : vector<16xf32>
    %c0_15 = arith.constant 0 : index
    %c0_16 = arith.constant 0 : index
    %19 = vector.load %arg7[%c0_15, %c0_16] : memref<1x16xf32, #tpu.memory_space<vmem>>, vector<1x16xf32>
    %20 = vector.shape_cast %19 : vector<1x16xf32> to vector<16xf32>
    %21 = vector.shape_cast %18 : vector<16xf32> to vector<1x16xf32>
    tpu.vector_store %arg7[%c0_15, %c0_16], %21 {strides = array<i32>} : memref<1x16xf32, #tpu.memory_space<vmem>>, vector<1x16xf32>,
    return
  }
  func.func @transform_0(%arg0: i32) -> (i32, i32) {
    %c0_i32 = arith.constant 0 : i32
    %c0_i32_0 = arith.constant 0 : i32
    return %arg0, %c0_i32 : i32, i32
  }
  func.func @transform_1(%arg0: i32) -> (i32, i32) {
    %c0_i32 = arith.constant 0 : i32
    %c0_i32_0 = arith.constant 0 : i32
    return %arg0, %c0_i32 : i32, i32
  }
  func.func @transform_2(%arg0: i32) -> (i32, i32) {
    %c0_i32 = arith.constant 0 : i32
    %c0_i32_0 = arith.constant 0 : i32
    %c0_i32_1 = arith.constant 0 : i32
    return %c0_i32, %c0_i32_0 : i32, i32
  }
  func.func @transform_3(%arg0: i32) -> (i32, i32) {
    %c0_i32 = arith.constant 0 : i32
    %c0_i32_0 = arith.constant 0 : i32
    %c0_i32_1 = arith.constant 0 : i32
    return %c0_i32, %c0_i32_0 : i32, i32
  }
  func.func @transform_4(%arg0: i32) -> (i32, i32) {
    %c0_i32 = arith.constant 0 : i32
    %c0_i32_0 = arith.constant 0 : i32
    %c0_i32_1 = arith.constant 0 : i32
    return %c0_i32, %c0_i32_0 : i32, i32
  }
  func.func @transform_5(%arg0: i32) -> (i32, i32) {
    %c0_i32 = arith.constant 0 : i32
    %c0_i32_0 = arith.constant 0 : i32
    %c0_i32_1 = arith.constant 0 : i32
    return %c0_i32, %c0_i32_0 : i32, i32
  }
  func.func @transform_6(%arg0: i32) -> (i32, i32) {
    %c0_i32 = arith.constant 0 : i32
    %c0_i32_0 = arith.constant 0 : i32
    return %c0_i32, %arg0 : i32, i32
  }
}

</mosaic_0001>

<bundles_post_ra>
// kernel: ncf_forward.1
= control target key start
LH: loop header
LB: loop body
LE: loop exit
PB: predicated region body
PF: predicated region fallthrough
CT: control target
= control target key end

     0   :  { %v223_v0 = vmov 0.0   ;;  %vm224_vm0 = vmmov 0   ;;  %vm44_vm1 = vcmask 130048   ;;  %vm160_vm2 = vcmask 261120   ;;  %s284_s3 = inlined_call_operand.vmem [shape: bf16[16,32], index: 3, kind: input, shape index: {}]   ;;  %s285_s2 = inlined_call_operand.vmem [shape: bf16[16,32], index: 2, kind: input, shape index: {}]   ;;  %s286_s1 = inlined_call_operand.vmem [shape: bf16[16,16], index: 1, kind: input, shape index: {}]   ;;  %s287_s0 = inlined_call_operand.vmem [shape: bf16[16,16], index: 0, kind: input, shape index: {}]   ;;  %s288_s4 = inlined_call_operand.vmem [shape: f32[2,32], index: 4, kind: input, shape index: {}]   ;;  %s289_s5 = inlined_call_operand.<no memory space> [shape: f32[1,1], index: 5, kind: input, shape index: {}]   ;;  %s290_s6 = inlined_call_operand.vmem [shape: f32[1,16], index: 6, kind: output, shape index: {}]  }
   0x1   :  { %205 = vmatprep.subr.bf16.mxu0 %v223_v0  ;;  %211 = vmatprep.subr.bf16.mxu1 %v223_v0  ;;  %v219_v1 = vld [vmem:[%s284_s3] sm:$0xff]   ;;  %v173_v25 = vlaneseq  ;;  %v168_v29 = vstv %s289_s5  ;;  %vm184_vm3 = vcmask 130112   ;;  %vm187_vm4 = vcmask 122880  }
   0x2   :  { %v220_v2 = vld [vmem:[%s285_s2] sm:$0xff]   ;;  %207 = vmatprep.mubr.msk.bf16.mxu0 %vm224_vm0, %v223_v0  ;;  %213 = vmatprep.mubr.msk.bf16.mxu1 %vm224_vm0, %v223_v0 }
   0x3   :  { %206 = vmatpush3.bf16.msra.mxu0 %v219_v1  ;;  %v221_v3 = vld [vmem:[%s286_s1] sm:$0xff]   ;;  %212 = vmatpush3.bf16.msra.mxu1 %v220_v2  ;;  %v174_v26 = vand.u32 127, %v173_v25  ;;  %v176_v27 = vshrl.u32 %v173_v25, 7 }
   0x4   :  { %v222_v4 = vld [vmem:[%s287_s0] sm:$0xff]  }
   0x5   :  { %v199_v7 = vld [vmem:[%s288_s4] ss:$0 sm:$0xff]  ;;  %v200_v14 = vld [vmem:[%s288_s4 + $0x1] ss:$0 sm:$0xff]  ;;  %v179_v28 = vadd.s32 4294967288, %v174_v26  ;;  %v177_v31 = vsub.s32 %v174_v26, %v176_v27 }
   0x6   :  { %208 = vmatmul.mubr.msk.bf16.vlgmr.msra.gmra.mxu0 %vm44_vm1, %v221_v3  ;;  %214 = vmatmul.mubr.msk.bf16.vlgmr.msra.gmra.mxu1 %vm44_vm1, %v222_v4 }
   0x7   :  { %v182_v33 = vsub.s32 %v179_v28, %v176_v27 }
  0xc6   :  { %v82_v5 = vpop.f32.mrf.mxu0  ;;  %v137_v6 = vpop.f32.mrf.mxu1 }
  0xc7   :  { %v138_v8 = vadd.f32 %v137_v6, %v82_v5 }
  0xc8   :  { %v209_v9 = vpop.f32.mrf.mxu0  ;;  %v215_v10 = vpop.f32.mrf.mxu1 }
  0xc9   :  { %v149_v11 = vadd.f32 %v199_v7, %v138_v8 }
  0xca   :  { %v85_v12 = vpop.f32.mrf.mxu0  ;;  %v140_v13 = vpop.f32.mrf.mxu1 }
  0xcb   :  { %v151_v15 = vmax.f32 %v149_v11, 0.0  ;;  %v141_v16 = vadd.f32 %v140_v13, %v85_v12 }
  0xcc   :  { %v210_v17 = vpop.f32.mrf.mxu0  ;;  %v216_v18 = vpop.f32.mrf.mxu1 }
  0xcd   :  { %v150_v19 = vadd.f32 %v199_v7, %v141_v16  ;;  %v158_v20 = vmul.f32 %v200_v14, %v151_v15 }
  0xcf   :  { %v152_v21 = vmax.f32 %v150_v19, 0.0  ;;  %v161_v22 = vsel %vm160_vm2, %v158_v20, 0.0 }
  0xd0   :  { %162 = vadd.xlane.f32.xlu0 %v161_v22 }
  0xd1   :  { %v159_v23 = vmul.f32 %v200_v14, %v152_v21 }
  0xd3   :  { %v164_v24 = vsel %vm160_vm2, %v159_v23, 0.0 }
  0xd4   :  { %165 = vadd.xlane.f32.xlu0 %v164_v24 }
 0x159   :  { %v163_v30 = vpop.xlane.xlu0 %162 }
 0x15a   :  { %v169_v32 = vadd.f32 %v168_v29, %v163_v30 }
 0x15c   :  { %v178_v36 = vrot.slane %v169_v32, %v177_v31 }
 0x15d   :  { %v166_v34 = vpop.xlane.xlu0 %165 }
 0x15e   :  { %v170_v35 = vadd.f32 %v168_v29, %v166_v34 }
 0x160   :  { %v183_v37 = vrot.slane %v170_v35, %v182_v33 }
 0x162   :  { %v185_v38 = vsel %vm184_vm3, %v183_v37, %v178_v36 }
 0x163   :  { %188 = vst.msk [vmem:[%s290_s6] sm:$0x1] %vm187_vm4, %v185_v38 }

</bundles_post_ra>
